<compile_context>
chip_gen: v5e
topology: v5e:2x2
jax: 0.10.0
libtpu: 0.0.40
codegen_flags: <defaults>
</compile_context>

<pallas_src>
from math import ceil

import jax
import jax.numpy as jnp
from jax.experimental import pallas as pl
from jax.experimental.pallas import tpu as pltpu


def _ceil_div(a, b):
    return -(-a // b)


def _round_up(a, b):
    return _ceil_div(a, b) * b


def _gaussian_fused_kernel(x_ref, w1_ref, b1_ref, w2t_ref, b2t_ref, out_ref):
    """One batch tile: fused two-head MLP, transposed lane-dense output.

    x_ref:   (TILE_B, K)   input dtype (cast to bf16 in-kernel)
    w1_ref:  (K, 2Hp)  bf16      b1_ref:  (1, 2Hp) f32
    w2t_ref: (8, 2Hp)  f32       b2t_ref: (8, 1)   f32
    out_ref: (8, TILE_B) f32: rows 0:3 means, 3:6 variances, 6:8 zero pad.
    """
    x = x_ref[...]
    if x.dtype != jnp.bfloat16:
        # In-kernel cast: VPU work on a free-ish slot, no extra HBM pass.
        x = x.astype(jnp.bfloat16)

    # Layer 1 (both heads at once): bf16 MXU matmul, f32 accumulation.
    h = jnp.dot(x, w1_ref[...], preferred_element_type=jnp.float32) + b1_ref[...]
    h = jnp.maximum(h, 0.0)            # ReLU; dropout is identity in eval mode.

    # Layer 2 (block-diagonal), computed directly transposed so the output is
    # lane-dense:  t[c, b] = sum_j w2t[c, j] * h[b, j]  ->  (8, TILE_B).
    # Standard MXU rhs-transposed pattern; kept in f32 (tiny weight).
    t = jnp.einsum("cj,bj->cb", w2t_ref[...], h,
                   preferred_element_type=jnp.float32) + b2t_ref[...]

    # exp() only on the variance rows (3:6); epilogue runs on packed vregs.
    row = jax.lax.broadcasted_iota(jnp.int32, t.shape, 0)
    is_var = (row >= 3) & (row < 6)
    out_ref[...] = jnp.where(is_var, jnp.exp(t), t)


def fuse_params(params):
    """Build the fused/casted weights ONCE (not per forward call).

    Linear weights are expected pre-transposed to (in_features, out_features).
    The fused hidden dim is zero-padded to a multiple of 128 lanes (exact math:
    padded hidden units are relu(0)=0 and multiply zero W2 columns).
    """
    k, h = params["w1_mean"].shape
    two_h = 2 * h
    two_hp = max(128, _round_up(two_h, 128))

    # Layer 1: both heads concatenated along the output axis -> (K, 2Hp), bf16.
    w1 = jnp.zeros((k, two_hp), jnp.float32)
    w1 = w1.at[:, :h].set(params["w1_mean"])
    w1 = w1.at[:, h:two_h].set(params["w1_var"])
    b1 = jnp.zeros((1, two_hp), jnp.float32)
    b1 = b1.at[:, :h].set(params["b1_mean"])
    b1 = b1.at[:, h:two_h].set(params["b1_var"])

    # Layer 2: block-diagonal, TRANSPOSED to (8, 2Hp) so the kernel's second
    # GEMM produces a lane-dense (8, TILE_B) tile directly.
    # Rows: 0:3 means, 3:6 log-sigmas, 6:8 padding. Kept in f32.
    w2t = jnp.zeros((8, two_hp), jnp.float32)
    w2t = w2t.at[0:3, :h].set(params["w2_mean"].T)
    w2t = w2t.at[3:6, h:two_h].set(params["w2_var"].T)
    b2t = jnp.zeros((8, 1), jnp.float32)
    b2t = b2t.at[0:3, :].set(params["b2_mean"].T)
    b2t = b2t.at[3:6, :].set(params["b2_var"].T)

    return {
        "w1": w1.astype(jnp.bfloat16),   # dominant weight stream in bf16
        "b1": b1.astype(jnp.float32),
        "w2t": w2t.astype(jnp.float32),  # second layer stays f32 (exp-sensitive)
        "b2t": b2t.astype(jnp.float32),
    }


def _choose_tile(n, max_tile_b):
    """Balanced batch tiling.

    * Small n: one full-array block (grid length 1).
    * Otherwise: an even number of near-equal tiles (keeps v7x's two
      TensorCores balanced under dimension_semantics=('parallel',)), with the
      tile row count rounded up to a multiple of 128 (lane width of the
      transposed output block).  The last block may be ragged (clipped DMA).
    """
    if n < 512:
        return n, 1
    tiles = _ceil_div(n, max_tile_b)
    if tiles % 2:
        tiles += 1
    tile_b = _round_up(_ceil_div(n, tiles), 128)
    return tile_b, _ceil_div(n, tile_b)


def single_gaussian_output_forward(x, fused, *, max_tile_b=2048,
                                   return_packed=False):
    """Pallas forward.

    x:     (batch, input_size) in its native dtype (f32 or bf16; no wrapper
           cast/pad -- the cast to bf16 happens inside the kernel).
    fused: output of fuse_params().
    Returns (means, variances), each (batch, 3) float32, or -- with
    return_packed=True -- the raw (8, batch) packed result (rows 0:3 means,
    3:6 variances) so a downstream consumer can slice lazily.
    """
    n, k = x.shape
    two_hp = fused["w1"].shape[1]
    tile_b, num_tiles = _choose_tile(n, max_tile_b)

    # Scoped-VMEM budget: only raise the limit when big tiles need it.
    # (v7x note: physical VMEM is 64 MiB; the cap below respects that.)
    x_itemsize = jnp.dtype(x.dtype).itemsize
    vmem_est = (
        2 * tile_b * k * x_itemsize                         # x tiles (double-buffered)
        + 2 * (k * two_hp * 2 + two_hp * 4 + 8 * two_hp * 4 + 8 * 4)  # weights
        + 2 * 8 * tile_b * 4                                # output tiles
        + tile_b * two_hp * 4 + 8 * tile_b * 4              # h / t intermediates
    )
    vmem_limit = None
    if vmem_est > 12 * 1024 * 1024:
        vmem_limit = int(min(2 * vmem_est, 64 * 1024 * 1024))

    flops = 2 * n * (k * two_hp + two_hp * 8)
    bytes_accessed = (n * k * x_itemsize + k * two_hp * 2
                      + (two_hp + 8 * two_hp + 8) * 4 + n * 8 * 4)

    # NOTE: the four grid-invariant operands below have constant index_maps
    # (fetched once).  On v7x with very large K, their double buffers can be
    # halved with pipeline_mode=pl.Buffered(1); left at the default here.
    out_t = pl.pallas_call(
        _gaussian_fused_kernel,
        out_shape=jax.ShapeDtypeStruct((8, n), jnp.float32),
        grid_spec=pltpu.PrefetchScalarGridSpec(
            num_scalar_prefetch=0,
            grid=(num_tiles,),
            in_specs=[
                pl.BlockSpec((tile_b, k), lambda i: (i, 0)),   # x tile (pipelined)
                pl.BlockSpec((k, two_hp), lambda i: (0, 0)),   # fused W1 (resident)
                pl.BlockSpec((1, two_hp), lambda i: (0, 0)),   # fused b1
                pl.BlockSpec((8, two_hp), lambda i: (0, 0)),   # block-diag W2^T
                pl.BlockSpec((8, 1), lambda i: (0, 0)),        # fused b2^T
            ],
            out_specs=pl.BlockSpec((8, tile_b), lambda i: (0, i)),
        ),
        compiler_params=pltpu.CompilerParams(
            dimension_semantics=("parallel",),                 # megacore on v7x
            vmem_limit_bytes=vmem_limit,
        ),
        cost_estimate=pl.CostEstimate(
            flops=flops, transcendentals=8 * n, bytes_accessed=bytes_accessed),
    )(x, fused["w1"], fused["b1"], fused["w2t"], fused["b2t"])

    if return_packed:
        return out_t                      # (8, n): rows 0:3 means, 3:6 variances
    means = out_t[0:3, :].T
    variances = out_t[3:6, :].T
    return means, variances


def init_params(key, input_size):
    """Deterministic init mimicking PyTorch Linear default (U(-1/sqrt(fan_in), +))."""
    hidden_size = ceil(input_size / 2)
    keys = jax.random.split(key, 8)

    def linear_init(kw, kb, fan_in, fan_out):
        bound = 1.0 / jnp.sqrt(jnp.float32(fan_in))
        w = jax.random.uniform(kw, (fan_in, fan_out), jnp.float32, -bound, bound)
        b = jax.random.uniform(kb, (1, fan_out), jnp.float32, -bound, bound)
        return w, b

    w1m, b1m = linear_init(keys[0], keys[1], input_size, hidden_size)
    w2m, b2m = linear_init(keys[2], keys[3], hidden_size, 3)
    w1v, b1v = linear_init(keys[4], keys[5], input_size, hidden_size)
    w2v, b2v = linear_init(keys[6], keys[7], hidden_size, 3)
    return {
        "w1_mean": w1m, "b1_mean": b1m, "w2_mean": w2m, "b2_mean": b2m,
        "w1_var": w1v, "b1_var": b1v, "w2_var": w2v, "b2_var": b2v,
    }


def _fused_reference(x, fused):
    """Pure-JAX reference using the SAME fused math as the kernel."""
    xb = x.astype(jnp.bfloat16)
    h = jnp.maximum(
        jnp.dot(xb, fused["w1"], preferred_element_type=jnp.float32) + fused["b1"], 0.0)
    t = jnp.einsum("cj,bj->cb", fused["w2t"], h,
                   preferred_element_type=jnp.float32) + fused["b2t"]
    return t[0:3, :].T, jnp.exp(t[3:6, :]).T


def _f32_reference(x, p):
    """Original unfused full-f32 reference (loose sanity check vs bf16 stream)."""
    h_m = jnp.maximum(x @ p["w1_mean"] + p["b1_mean"], 0.0)
    means = h_m @ p["w2_mean"] + p["b2_mean"]
    h_v = jnp.maximum(x @ p["w1_var"] + p["b1_var"], 0.0)
    variances = jnp.exp(h_v @ p["w2_var"] + p["b2_var"])
    return means, variances


if __name__ == "__main__":
    batch = 8
    input_size = 32   # hidden_size = 16, fused (padded) hidden = 128

    key = jax.random.PRNGKey(0)
    k_x, k_p = jax.random.split(key)
    x = jax.random.normal(k_x, (batch, input_size), jnp.float32)
    params = init_params(k_p, input_size)
    fused = fuse_params(params)

    means, variances = single_gaussian_output_forward(x, fused)
    jax.block_until_ready((means, variances))

    # Reference with the same fused math (tolerance covers MXU-vs-XLA f32
    # precision-mode differences in the tiny second GEMM).
    ref_means, ref_vars = _fused_reference(x, fused)
    assert jnp.allclose(means, ref_means, atol=1e-2, rtol=1e-2)
    assert jnp.allclose(variances, ref_vars, atol=1e-2, rtol=1e-2)

    # Loose sanity check against the original full-f32 unfused math.
    f32_means, f32_vars = _f32_reference(x, params)
    assert jnp.allclose(means, f32_means, atol=5e-2, rtol=5e-2)
    assert jnp.allclose(variances, f32_vars, atol=5e-2, rtol=5e-2)

    # TODO(synk): compute_loss / sample_tracking_directions (MultivariateNormal
    # log_prob / sampling) are not part of forward() and are left in plain JAX.
    print("KERNEL_OK")
</pallas_src>

<mosaic_0001>
module attributes {stable_mosaic.version = 11 : i64} {
  func.func @_gaussian_fused_kernel(%arg0: i32, %arg1: memref<8x32xf32, #tpu.memory_space<vmem>>, %arg2: memref<32x128xbf16, #tpu.memory_space<vmem>>, %arg3: memref<1x128xf32, #tpu.memory_space<vmem>>, %arg4: memref<8x128xf32, #tpu.memory_space<vmem>>, %arg5: memref<8x1xf32, #tpu.memory_space<vmem>>, %arg6: memref<8x8xf32, #tpu.memory_space<vmem>>) attributes {dimension_semantics = [#tpu.dimension_semantics<parallel>], iteration_bounds = array<i64: 1>, scalar_prefetch = 0 : i64, scratch_operands = 0 : i64, tpu.core_type = #tpu.core_type<tc>, window_params = [{transform_indices = @transform_0, window_bounds = array<i64: 8, 32>}, {pipeline_mode = #tpu.pipeline_mode<synchronous>, transform_indices = @transform_1, window_bounds = array<i64: 32, 128>}, {pipeline_mode = #tpu.pipeline_mode<synchronous>, transform_indices = @transform_2, window_bounds = array<i64: 1, 128>}, {pipeline_mode = #tpu.pipeline_mode<synchronous>, transform_indices = @transform_3, window_bounds = array<i64: 8, 128>}, {pipeline_mode = #tpu.pipeline_mode<synchronous>, transform_indices = @transform_4, window_bounds = array<i64: 8, 1>}, {transform_indices = @transform_5, window_bounds = array<i64: 8, 8>}]} {
    %c0 = arith.constant 0 : index
    %c0_0 = arith.constant 0 : index
    %0 = vector.load %arg1[%c0, %c0_0] : memref<8x32xf32, #tpu.memory_space<vmem>>, vector<8x32xf32>
    %1 = arith.truncf %0 : vector<8x32xf32> to vector<8x32xbf16>
    %c0_1 = arith.constant 0 : index
    %c0_2 = arith.constant 0 : index
    %2 = vector.load %arg2[%c0_1, %c0_2] : memref<32x128xbf16, #tpu.memory_space<vmem>>, vector<32x128xbf16>
    %cst = arith.constant dense<0.000000e+00> : vector<8x128xf32>
    %3 = tpu.matmul %1, %2, %cst {dimension_numbers = #tpu.dot_dimension_numbers<[1], [0], [0], [1], [0, 0, 1, 1], [], []>} : vector<8x32xbf16>, vector<32x128xbf16>, vector<8x128xf32> -> vector<8x128xf32>
    %c0_3 = arith.constant 0 : index
    %c0_4 = arith.constant 0 : index
    %4 = vector.load %arg3[%c0_3, %c0_4] : memref<1x128xf32, #tpu.memory_space<vmem>>, vector<1x128xf32>
    %5 = vector.broadcast %4 : vector<1x128xf32> to vector<8x128xf32>
    %6 = arith.addf %3, %5 : vector<8x128xf32>
    %cst_5 = arith.constant 0.000000e+00 : f32
    %7 = vector.broadcast %cst_5 : f32 to vector<8x128xf32>
    %8 = arith.maximumf %6, %7 : vector<8x128xf32>
    %c0_6 = arith.constant 0 : index
    %c0_7 = arith.constant 0 : index
    %9 = vector.load %arg4[%c0_6, %c0_7] : memref<8x128xf32, #tpu.memory_space<vmem>>, vector<8x128xf32>
    "tpu.trace_start"() <{level = 10 : i32, message = "cj,bj->cb"}> : () -> ()
    %cst_8 = arith.constant dense<0.000000e+00> : vector<8x8xf32>
    %10 = tpu.matmul %9, %8, %cst_8 {dimension_numbers = #tpu.dot_dimension_numbers<[1], [1], [0], [0], [0, 0, 1, 0], [], []>} : vector<8x128xf32>, vector<8x128xf32>, vector<8x8xf32> -> vector<8x8xf32>
    "tpu.trace_stop"() : () -> ()
    %c0_9 = arith.constant 0 : index
    %c0_10 = arith.constant 0 : index
    %11 = vector.load %arg5[%c0_9, %c0_10] : memref<8x1xf32, #tpu.memory_space<vmem>>, vector<8x1xf32>
    %12 = vector.broadcast %11 : vector<8x1xf32> to vector<8x8xf32>
    %13 = arith.addf %10, %12 : vector<8x8xf32>
    %14 = tpu.iota {dimensions = array<i32: 0>} : vector<8x8xi32>
    %c3_i32 = arith.constant 3 : i32
    %15 = vector.broadcast %c3_i32 : i32 to vector<8x8xi32>
    %16 = arith.cmpi sge, %14, %15 : vector<8x8xi32>
    %c6_i32 = arith.constant 6 : i32
    %17 = vector.broadcast %c6_i32 : i32 to vector<8x8xi32>
    %18 = arith.cmpi slt, %14, %17 : vector<8x8xi32>
    %19 = arith.andi %16, %18 : vector<8x8xi1>
    %20 = math.exp %13 : vector<8x8xf32>
    %21 = arith.select %19, %20, %13 : vector<8x8xi1>, vector<8x8xf32>
    %c0_11 = arith.constant 0 : index
    %c0_12 = arith.constant 0 : index
    %22 = vector.load %arg6[%c0_11, %c0_12] : memref<8x8xf32, #tpu.memory_space<vmem>>, vector<8x8xf32>
    tpu.vector_store %arg6[%c0_11, %c0_12], %21 {strides = array<i32>} : memref<8x8xf32, #tpu.memory_space<vmem>>, vector<8x8xf32>,
    return
  }
  func.func @transform_0(%arg0: i32) -> (i32, i32) {
    %c0_i32 = arith.constant 0 : i32
    %c0_i32_0 = arith.constant 0 : i32
    return %arg0, %c0_i32 : i32, i32
  }
  func.func @transform_1(%arg0: i32) -> (i32, i32) {
    %c0_i32 = arith.constant 0 : i32
    %c0_i32_0 = arith.constant 0 : i32
    %c0_i32_1 = arith.constant 0 : i32
    return %c0_i32, %c0_i32_0 : i32, i32
  }
  func.func @transform_2(%arg0: i32) -> (i32, i32) {
    %c0_i32 = arith.constant 0 : i32
    %c0_i32_0 = arith.constant 0 : i32
    %c0_i32_1 = arith.constant 0 : i32
    return %c0_i32, %c0_i32_0 : i32, i32
  }
  func.func @transform_3(%arg0: i32) -> (i32, i32) {
    %c0_i32 = arith.constant 0 : i32
    %c0_i32_0 = arith.constant 0 : i32
    %c0_i32_1 = arith.constant 0 : i32
    return %c0_i32, %c0_i32_0 : i32, i32
  }
  func.func @transform_4(%arg0: i32) -> (i32, i32) {
    %c0_i32 = arith.constant 0 : i32
    %c0_i32_0 = arith.constant 0 : i32
    %c0_i32_1 = arith.constant 0 : i32
    return %c0_i32, %c0_i32_0 : i32, i32
  }
  func.func @transform_5(%arg0: i32) -> (i32, i32) {
    %c0_i32 = arith.constant 0 : i32
    %c0_i32_0 = arith.constant 0 : i32
    return %c0_i32, %arg0 : i32, i32
  }
}

</mosaic_0001>

<bundles_post_ra>
// kernel: tpu_custom_call.1
= control target key start
LH: loop header
LB: loop body
LE: loop exit
PB: predicated region body
PF: predicated region fallthrough
CT: control target
= control target key end

     0   :  { %10 = vsyncpa [#allocation3], 0  ;;  %s300_s0 = inlined_call_operand.vmem [shape: f32[8,32], index: 0, kind: input, shape index: {}]   ;;  %s301_s1 = inlined_call_operand.hbm [shape: bf16[32,128], index: 1, kind: input, shape index: {}]   ;;  %s302_s2 = inlined_call_operand.vmem [shape: f32[1,128], index: 2, kind: input, shape index: {}]   ;;  %s303_s3 = inlined_call_operand.hbm [shape: f32[8,128], index: 3, kind: input, shape index: {}]   ;;  %s304_s4 = inlined_call_operand.vmem [shape: f32[8,1], index: 4, kind: input, shape index: {}]   ;;  %s305_s5 = inlined_call_operand.hbm [shape: f32[8,8], index: 5, kind: output, shape index: {}]  }
   0x1   :  { %11 = vsyncpa [#allocation6], 0 }
   0x2   :  { %12 = vsyncpa [#allocation4], 0  ;;  %s19_s20 = sshll.u32 %s301_s1, 4  ;;  %s246_s21 = smov [#allocation2]   ;;  %s20_s20 = int_to_ptr.hbm [resolvable:$true] %s19_s20 }
   0x3   :  { %s21_s22 = sshll.u32 %s246_s21, 4  ;;  %s35_s25 = sshll.u32 %s303_s3, 4  ;;  %s22_s22 = int_to_ptr.vmem [resolvable:$true] %s21_s22  ;;  %s36_s25 = int_to_ptr.hbm [resolvable:$true] %s35_s25 }
   0x4   :  { %s247_s26 = smov 64   ;;  %s248_s27 = smov 4  }
   0x5   :  { %27 = dma.hbm_to_vmem [thread:$0]  %s20_s20, 256, %s22_s22, [#allocation3], %s247_s26, %s247_s26, %s248_s27  }
   0x6   :  { %s249_s28 = smov [#allocation5]  }
   0x7   :  { %s37_s29 = sshll.u32 %s249_s28, 4  ;;  %s38_s29 = int_to_ptr.vmem [resolvable:$true] %s37_s29 }
   0x8   :  { %40 = dma.hbm_to_vmem [thread:$0]  %s36_s25, 128, %s38_s29, [#allocation6]  }
   0x9   :  { %240 = dma.done.wait [#allocation3], 256  }
   0xa   :  { %241 = vsyncadd [#allocation3], 4294967040 }
   0xb   :  { %242 = dma.done.wait [#allocation6], 128  }
   0xc   :  { %243 = vsyncadd [#allocation6], 4294967168  ;;  %v157_v0 = vld [vmem:[#allocation2 + $0x8] sm:$0xff]  ;;  %v156_v1 = vld [vmem:[#allocation2] sm:$0xff]  ;;  %vm74_vm0 = vcmask 261120   ;;  %v250_v5 = vmov 0   ;;  %v119_v13 = vlaneseq }
   0xd   :  { %84 = vmatpush.bf16.msra.mxu0 %v157_v0  ;;  %v52_v2 = vld [vmem:[%s300_s0] sm:$0xff]  ;;  %164 = vset.pattern.permute.xlu0 %v250_v5  ;;  %v92_v10 = vld [vmem:[#allocation5] sm:$0xff]  ;;  %s251_s0 = smov [#allocation7]   ;;  %s136_s10 = sshll.u32 %s305_s5, 4  ;;  %vm127_vm4 = vcmask 64512   ;;  %s137_s10 = int_to_ptr.hbm [resolvable:$true] %s136_s10 }
   0xe   :  { %v53_v3 = vpack.c.bf16 %v52_v2, %v52_v2  ;;  %v93_v4 = vld [vmem:[%s304_s4] sm:$0xff]  ;;  %v120_v16 = vshrl.u32 %v119_v13, 7  ;;  %s134_s4 = sshll.u32 %s251_s0, 4  ;;  %s135_s4 = int_to_ptr.vmem [resolvable:$true] %s134_s4 }
   0xf   :  { %96 = vperm.xlu0 %164, %v93_v4   ;;  %v165_v6 = vld [vmem:[%s302_s2] ss:$0 sm:$0xff] }
  0x10   :  { %vm121_vm1 = vcmp.ge.s32.totalorder %v120_v16, 3  ;;  %vm122_vm2 = vcmp.lt.s32.totalorder %v120_v16, 6 }
  0x11   :  { %85 = vmatpush.bf16.msra.mxu0 %v156_v1  ;;  %vm123_vm3 = vmand %vm121_vm1, %vm122_vm2 }
  0x14   :  { %155 = vmatmul.msk.bf16.vlgmr.msra.gmra.mxu0 %vm74_vm0, %v53_v3 }
  0x81   :  { %v97_v12 = vpop.permute.xlu0 %96 }
  0x91   :  { %v87_v7 = vpop.f32.mrf.mxu0 }
  0x92   :  { %v88_v8 = vadd.f32 %v165_v6, %v87_v7 }
  0x94   :  { %v91_v9 = vmax.f32 %v88_v8, 0.0 }
  0x96   :  { %114 = vmatpush.xpose.msra.mxu1 %v91_v9 }
  0x99   :  { %v89_v11 = vpop.f32.mrf.mxu0  ;;  %115 = vmatmul.f32.vlgmr.msra.gmra.mxu1 %v92_v10 }
 0x116   :  { %v116_v14 = vpop.f32.mrf.mxu1 }
 0x117   :  { %v117_v15 = vadd.f32 %v116_v14, %v97_v12 }
 0x119   :  { %v124_v17 = vmul.f32 1.442695, %v117_v15 }
 0x11b   :  { %166 = vpow2.f32 %v124_v17 }
 0x121   :  { %v167_v18 = vpop.eup %166 }
 0x122   :  { %v126_v19 = vsel %vm123_vm3, %v167_v18, %v117_v15 }
 0x123   :  { %128 = vst.msk [vmem:[#allocation7] sm:$0xff] %vm127_vm4, %v126_v19 }
 0x124   :  { %139 = dma.vmem_to_hbm [thread:$0]  %s135_s4, 128, %s137_s10, [#allocation4]  }
 0x125   :  { %244 = dma.done.wait [#allocation4], 128  }
 0x126   :  { %245 = vsyncadd [#allocation4], 4294967168 }
 0x127   :  { %144 = vsyncpa [#allocation3], 1 }
 0x128   :  { %145 = vsyncpa [#allocation6], 1 }
 0x129   :  { %146 = vsyncpa [#allocation4], 1 }

</bundles_post_ra>
